<compile_context>
chip_gen: v7x
topology: tpu7x:2x2x1
jax: 0.10.0
libtpu: 0.0.40
codegen_flags: <defaults>
</compile_context>

<pallas_src>
import jax
import jax.numpy as jnp
from jax.experimental import pallas as pl
from jax.experimental.pallas import tpu as pltpu


# ------------------------------ kernels ------------------------------------ #

def _fused_kernel(w_ref, x_ref, o_ref, pad_ref):
    # w_ref:          (3,) f32 Conv1d weight in SMEM.
    # x_ref / o_ref:  (C, hw) in the input dtype (batch dim squeezed).
    # pad_ref:        (C + 16, 1) f32 VMEM scratch holding zero-padded means.
    C = x_ref.shape[0]
    hw = x_ref.shape[1]

    # Spatial mean per channel (f32 accumulation).
    m = jnp.sum(x_ref[...].astype(jnp.float32), axis=-1, keepdims=True) * (1.0 / hw)

    # 3-tap channel conv with zero padding: write the means at an aligned
    # sublane offset (8) and read the +-1 neighbours at offsets 7 / 9.
    pad_ref[...] = jnp.zeros_like(pad_ref)
    pad_ref[8:8 + C, :] = m
    m_prev = pad_ref[7:7 + C, :]          # mean[c-1] (zero padded)
    m_next = pad_ref[9:9 + C, :]          # mean[c+1] (zero padded)

    gate = jax.nn.sigmoid(w_ref[0] * m_prev + w_ref[1] * m + w_ref[2] * m_next)
    o_ref[...] = x_ref[...] * gate.astype(o_ref.dtype)


def _pool_kernel(x_ref, sum_ref, acc_ref):
    # x_ref:   (tile_c, tile_s) input dtype.
    # sum_ref: (tile_c, 1) f32 output block (per-channel spatial sum).
    # acc_ref: (tile_c, 128) f32 lane-dense accumulator scratch.
    @pl.when(pl.program_id(2) == 0)
    def _init():
        acc_ref[...] = jnp.zeros_like(acc_ref)

    tile_s = x_ref.shape[1]
    if tile_s % 128 == 0:
        # Lane-dense VALU accumulation; no per-step XLU reduce / masked store.
        acc = acc_ref[...]
        for j in range(tile_s // 128):
            acc = acc + x_ref[:, j * 128:(j + 1) * 128].astype(jnp.float32)
        acc_ref[...] = acc
    else:
        # hw has no multiple-of-128 divisor: lane-sparse but correct fallback.
        acc_ref[:, :1] += jnp.sum(x_ref[...].astype(jnp.float32),
                                  axis=-1, keepdims=True)

    @pl.when(pl.program_id(2) == pl.num_programs(2) - 1)
    def _finalize():
        sum_ref[...] = jnp.sum(acc_ref[...], axis=-1, keepdims=True)


def _scale_kernel(x_ref, g_ref, o_ref):
    # x_ref / o_ref: (tile_c, tile_s) input dtype; g_ref: (tile_c, 1) input dtype.
    o_ref[...] = x_ref[...] * g_ref[...]


# --------------------------- tiling helpers --------------------------------- #

def _tpu_vmem_capacity_bytes():
    try:
        return int(pltpu.get_tpu_info().vmem_capacity_bytes)
    except Exception:
        return 64 << 20                       # conservative (v7x-class)


def _budgets():
    """(per-pipelined-buffer block budget, vmem_limit cap), per chip class."""
    cap = _tpu_vmem_capacity_bytes()
    if cap >= (96 << 20):                     # v5e / v6e class: 128 MiB VMEM
        return 12 << 20, 100 << 20
    return 6 << 20, 52 << 20                  # v7x class: 64 MiB VMEM


def _vmem_limit(vmem_cap, *buffer_bytes):
    need = 2 * sum(buffer_bytes) + (4 << 20)  # double-buffered pipeline + headroom
    return int(min(max(need, 32 << 20), vmem_cap))


def _pick_spatial_tile(hw, rows, itemsize, budget_bytes):
    """Largest multiple-of-128 divisor of hw whose (rows, tile) block fits."""
    cands = [d for d in range(128, hw + 1, 128) if hw % d == 0]
    fitting = [d for d in cands if rows * d * itemsize <= budget_bytes]
    if fitting:
        return max(fitting)
    if cands:
        return min(cands)
    return hw          # last dim equal to the full array dim is always legal


def _pick_channel_tile(C, max_tile=256):
    for t in (256, 128, 64, 32, 16, 8):
        if t <= max_tile and C % t == 0:
            return t
    return C           # full channel dim is always legal


# ------------------------------ wrapper ------------------------------------- #

def eca_forward(x, conv_w, *, force_two_pass=False):
    """x: (B, C, H, W) NCHW; conv_w: (1, 1, 3) Conv1d weight (no bias)."""
    B, C, H, W = x.shape
    hw = H * W
    dtype = x.dtype
    itemsize = jnp.dtype(dtype).itemsize

    xr = x.reshape(B, C, hw)                  # free reshape, keep input dtype
    w = conv_w.reshape(3).astype(jnp.float32)

    block_budget, vmem_cap = _budgets()

    # ---------------- fused single-pass path (2x HBM traffic) ----------------
    slab = C * hw * itemsize                  # one batch's (C, hw) block
    fused_need = 2 * (2 * slab) + (4 << 20)   # double-buffered in + out blocks
    if (not force_two_pass) and fused_need <= vmem_cap:
        out = pl.pallas_call(
            _fused_kernel,
            out_shape=jax.ShapeDtypeStruct((B, C, hw), dtype),
            grid=(B,),
            in_specs=[
                pl.BlockSpec(memory_space=pltpu.MemorySpace.SMEM),        # weight
                pl.BlockSpec((None, C, hw), lambda b: (b, 0, 0)),
            ],
            out_specs=pl.BlockSpec((None, C, hw), lambda b: (b, 0, 0)),
            scratch_shapes=[pltpu.VMEM((C + 16, 1), jnp.float32)],
            compiler_params=pltpu.CompilerParams(
                dimension_semantics=("parallel",),
                vmem_limit_bytes=_vmem_limit(vmem_cap, 2 * slab),
            ),
        )(w, xr)
        return out.reshape(B, C, H, W)

    # ---------------- two-pass fallback (3x HBM traffic) ---------------------
    tile_c = _pick_channel_tile(C)

    # Pass 1: per-(batch, channel) spatial sum.  Channel axis is "parallel"
    # so v7x's two TensorCores are used even when B is small.
    tile_s1 = _pick_spatial_tile(hw, tile_c, itemsize, block_budget)
    sums = pl.pallas_call(
        _pool_kernel,
        out_shape=jax.ShapeDtypeStruct((B, C, 1), jnp.float32),
        grid=(B, C // tile_c, hw // tile_s1),
        in_specs=[pl.BlockSpec((None, tile_c, tile_s1), lambda b, c, s: (b, c, s))],
        out_specs=pl.BlockSpec((None, tile_c, 1), lambda b, c, s: (b, c, 0)),
        scratch_shapes=[pltpu.VMEM((tile_c, 128), jnp.float32)],
        compiler_params=pltpu.CompilerParams(
            dimension_semantics=("parallel", "parallel", "arbitrary"),
            vmem_limit_bytes=_vmem_limit(
                vmem_cap, tile_c * tile_s1 * itemsize, tile_c * 4),
        ),
    )(xr)

    # Tiny O(B*C) gate math in plain JAX: conv1d(k=3, zero pad) + sigmoid.
    means = sums[:, :, 0] * (1.0 / hw)                          # (B, C) f32
    m_prev = jnp.pad(means, ((0, 0), (1, 0)))[:, :C]
    m_next = jnp.pad(means, ((0, 0), (0, 1)))[:, 1:]
    gate = jax.nn.sigmoid(w[0] * m_prev + w[1] * means + w[2] * m_next)
    gate = gate.astype(dtype)[:, :, None]                       # (B, C, 1)

    # Pass 2: out = x * gate (single lane-sparse side input, pure stream).
    tile_s2 = _pick_spatial_tile(hw, 2 * tile_c, itemsize, block_budget)
    out = pl.pallas_call(
        _scale_kernel,
        out_shape=jax.ShapeDtypeStruct((B, C, hw), dtype),
        grid=(B, C // tile_c, hw // tile_s2),
        in_specs=[
            pl.BlockSpec((None, tile_c, tile_s2), lambda b, c, s: (b, c, s)),
            pl.BlockSpec((None, tile_c, 1), lambda b, c, s: (b, c, 0)),
        ],
        out_specs=pl.BlockSpec((None, tile_c, tile_s2), lambda b, c, s: (b, c, s)),
        compiler_params=pltpu.CompilerParams(
            dimension_semantics=("parallel", "parallel", "parallel"),
            vmem_limit_bytes=_vmem_limit(
                vmem_cap,
                tile_c * tile_s2 * itemsize,    # x block
                tile_c * tile_s2 * itemsize,    # out block
                tile_c * itemsize),             # gate block
        ),
    )(xr, gate)
    return out.reshape(B, C, H, W)


# ------------------------------ reference ----------------------------------- #

def eca_reference(x, conv_w):
    """Plain-JAX reference matching the PyTorch forward."""
    w = conv_w.reshape(3).astype(jnp.float32)
    y = jnp.mean(x.astype(jnp.float32), axis=(2, 3))            # (B, C)
    yp = jnp.pad(y, ((0, 0), (1, 1)))                           # zero pad channels
    yc = w[0] * yp[:, :-2] + w[1] * yp[:, 1:-1] + w[2] * yp[:, 2:]
    s = jax.nn.sigmoid(yc)[:, :, None, None]
    return (x.astype(jnp.float32) * s).astype(x.dtype)


if __name__ == "__main__":
    key = jax.random.PRNGKey(0)
    kx, kw = jax.random.split(key)

    B, C, H, W = 2, 4, 16, 16
    x = jax.random.normal(kx, (B, C, H, W), dtype=jnp.float32)

    # Deterministic Conv1d(1, 1, 3, bias=False) weight, shape (1, 1, 3),
    # drawn uniformly in the PyTorch default-init range (+-1/sqrt(fan_in=3)).
    bound = 1.0 / jnp.sqrt(3.0)
    conv_w = jax.random.uniform(kw, (1, 1, 3), dtype=jnp.float32,
                                minval=-bound, maxval=bound)

    ref = eca_reference(x, conv_w)

    # Fused single-pass path (selected automatically at this size).
    out_fused = eca_forward(x, conv_w)
    jax.block_until_ready(out_fused)
    assert out_fused.shape == x.shape
    assert jnp.allclose(out_fused, ref, atol=1e-5, rtol=1e-5)

    # Two-pass fallback path (exercised explicitly so both paths stay green).
    out_two = eca_forward(x, conv_w, force_two_pass=True)
    jax.block_until_ready(out_two)
    assert jnp.allclose(out_two, ref, atol=1e-5, rtol=1e-5)

    print("KERNEL_OK")
</pallas_src>

<mosaic_0001>
module attributes {stable_mosaic.version = 11 : i64} {
  func.func @_fused_kernel(%arg0: i32, %arg1: memref<3xf32, #tpu.memory_space<smem>>, %arg2: memref<1x4x256xf32, #tpu.memory_space<vmem>>, %arg3: memref<1x4x256xf32, #tpu.memory_space<vmem>>, %arg4: memref<20x1xf32, #tpu.memory_space<vmem>>) attributes {dimension_semantics = [#tpu.dimension_semantics<parallel>], iteration_bounds = array<i64: 2>, scalar_prefetch = 0 : i64, scratch_operands = 1 : i64, tpu.core_type = #tpu.core_type<tc>, window_params = [{transform_indices = @transform_0, window_bounds = array<i64: 3>}, {transform_indices = @transform_1, window_bounds = array<i64: 1, 4, 256>}, {transform_indices = @transform_2, window_bounds = array<i64: 1, 4, 256>}]} {
    %c0 = arith.constant 0 : index
    %c0_0 = arith.constant 0 : index
    %c0_1 = arith.constant 0 : index
    %0 = vector.load %arg2[%c0, %c0_0, %c0_1] : memref<1x4x256xf32, #tpu.memory_space<vmem>>, vector<1x4x256xf32>
    %1 = vector.shape_cast %0 : vector<1x4x256xf32> to vector<4x256xf32>
    %cst = arith.constant dense<0.000000e+00> : vector<4xf32>
    %2 = vector.multi_reduction <add>, %1, %cst [1] : vector<4x256xf32> to vector<4xf32>
    %3 = vector.shape_cast %2 : vector<4xf32> to vector<4x1xf32>
    %cst_2 = arith.constant 3.906250e-03 : f32
    %4 = vector.broadcast %cst_2 : f32 to vector<4x1xf32>
    %5 = arith.mulf %3, %4 : vector<4x1xf32>
    %cst_3 = arith.constant 0.000000e+00 : f32
    %6 = vector.broadcast %cst_3 : f32 to vector<20x1xf32>
    %c0_4 = arith.constant 0 : index
    %c0_5 = arith.constant 0 : index
    %7 = vector.load %arg4[%c0_4, %c0_5] : memref<20x1xf32, #tpu.memory_space<vmem>>, vector<20x1xf32>
    tpu.vector_store %arg4[%c0_4, %c0_5], %6 {strides = array<i32>} : memref<20x1xf32, #tpu.memory_space<vmem>>, vector<20x1xf32>,
    %c8 = arith.constant 8 : index
    %c0_6 = arith.constant 0 : index
    %8 = vector.load %arg4[%c8, %c0_6] : memref<20x1xf32, #tpu.memory_space<vmem>>, vector<4x1xf32>
    tpu.vector_store %arg4[%c8, %c0_6], %5 {strides = array<i32>} : memref<20x1xf32, #tpu.memory_space<vmem>>, vector<4x1xf32>,
    %c7 = arith.constant 7 : index
    %c0_7 = arith.constant 0 : index
    %9 = vector.load %arg4[%c7, %c0_7] : memref<20x1xf32, #tpu.memory_space<vmem>>, vector<4x1xf32>
    %c9 = arith.constant 9 : index
    %c0_8 = arith.constant 0 : index
    %10 = vector.load %arg4[%c9, %c0_8] : memref<20x1xf32, #tpu.memory_space<vmem>>, vector<4x1xf32>
    %c0_9 = arith.constant 0 : index
    %11 = memref.load %arg1[%c0_9] : memref<3xf32, #tpu.memory_space<smem>>
    %12 = vector.broadcast %11 : f32 to vector<4x1xf32>
    %13 = arith.mulf %12, %9 : vector<4x1xf32>
    %c1 = arith.constant 1 : index
    %14 = memref.load %arg1[%c1] : memref<3xf32, #tpu.memory_space<smem>>
    %15 = vector.broadcast %14 : f32 to vector<4x1xf32>
    %16 = arith.mulf %15, %5 : vector<4x1xf32>
    %17 = arith.addf %13, %16 : vector<4x1xf32>
    %c2 = arith.constant 2 : index
    %18 = memref.load %arg1[%c2] : memref<3xf32, #tpu.memory_space<smem>>
    %19 = vector.broadcast %18 : f32 to vector<4x1xf32>
    %20 = arith.mulf %19, %10 : vector<4x1xf32>
    %21 = arith.addf %17, %20 : vector<4x1xf32>
    %22 = arith.negf %21 : vector<4x1xf32>
    %23 = math.exp %22 : vector<4x1xf32>
    %cst_10 = arith.constant 1.000000e+00 : f32
    %24 = vector.broadcast %cst_10 : f32 to vector<4x1xf32>
    %25 = arith.addf %24, %23 : vector<4x1xf32>
    %26 = arith.divf %24, %25 : vector<4x1xf32>
    %c0_11 = arith.constant 0 : index
    %c0_12 = arith.constant 0 : index
    %c0_13 = arith.constant 0 : index
    %27 = vector.load %arg2[%c0_11, %c0_12, %c0_13] : memref<1x4x256xf32, #tpu.memory_space<vmem>>, vector<1x4x256xf32>
    %28 = vector.shape_cast %27 : vector<1x4x256xf32> to vector<4x256xf32>
    %29 = vector.broadcast %26 : vector<4x1xf32> to vector<4x256xf32>
    %30 = arith.mulf %28, %29 : vector<4x256xf32>
    %c0_14 = arith.constant 0 : index
    %c0_15 = arith.constant 0 : index
    %c0_16 = arith.constant 0 : index
    %31 = vector.load %arg3[%c0_14, %c0_15, %c0_16] : memref<1x4x256xf32, #tpu.memory_space<vmem>>, vector<1x4x256xf32>
    %32 = vector.shape_cast %31 : vector<1x4x256xf32> to vector<4x256xf32>
    %33 = vector.shape_cast %30 : vector<4x256xf32> to vector<1x4x256xf32>
    tpu.vector_store %arg3[%c0_14, %c0_15, %c0_16], %33 {strides = array<i32>} : memref<1x4x256xf32, #tpu.memory_space<vmem>>, vector<1x4x256xf32>,
    return
  }
  func.func @transform_0(%arg0: i32) -> i32 {
    %c0_i32 = arith.constant 0 : i32
    %c0_i32_0 = arith.constant 0 : i32
    return %c0_i32 : i32
  }
  func.func @transform_1(%arg0: i32) -> (i32, i32, i32) {
    %c0_i32 = arith.constant 0 : i32
    %c0_i32_0 = arith.constant 0 : i32
    %c0_i32_1 = arith.constant 0 : i32
    return %arg0, %c0_i32, %c0_i32_0 : i32, i32, i32
  }
  func.func @transform_2(%arg0: i32) -> (i32, i32, i32) {
    %c0_i32 = arith.constant 0 : i32
    %c0_i32_0 = arith.constant 0 : i32
    %c0_i32_1 = arith.constant 0 : i32
    return %arg0, %c0_i32, %c0_i32_0 : i32, i32, i32
  }
}

</mosaic_0001>

<bundles_post_ra>
// kernel: tpu_custom_call.1
= control target key start
LH: loop header
LB: loop body
LE: loop exit
PB: predicated region body
PF: predicated region fallthrough
CT: control target
= control target key end

     0   :  { %7 = vsyncpa [#allocation6], 0  ;;  %s753_s0 = inlined_call_operand.hbm [shape: f32[3], index: 0, kind: input, shape index: {}]   ;;  %s754_s1 = inlined_call_operand.hbm [shape: f32[2,4,256], index: 1, kind: input, shape index: {}]   ;;  %s755_s2 = inlined_call_operand.hbm [shape: f32[2,4,256], index: 2, kind: output, shape index: {}]  }
   0x1   :  { %8 = vsyncpa [#allocation4], 0 }
   0x2   :  { %10 = vsyncpa [#allocation4 + $0x1], 0 }
   0x3   :  { %11 = vsyncpa [#allocation5], 0 }
   0x4   :  { %13 = vsyncpa [#allocation5 + $0x1], 0  ;;  %s543_s9 = smov 0   ;;  %s545_s10 = smov 0  }
   0x5   :  { %s547_s11 = smov 0   ;;  %s549_s12 = smov 0  }
   0x6 LB: > { %s564_s13 = sadd.s32 4294967295, %s520_s12   ;;  %s320_s14 = sadd.s32 4294967294, %s520_s12   ;;  %s520_s12 = sphi %s549_s12, %s776_s12   ;;  %s516_s11 = sphi %s547_s11, %s775_s11   ;;  %s512_s10 = sphi %s545_s10, %s774_s10   ;;  %s508_s9 = sphi %s543_s9, %s773_s9  }
   0x7   : > { %p60_p0 = scmp.ne.s32.totalorder %s512_s10, %s508_s9  ;;  %p756_p1 = scmp.eq.s32.totalorder %s564_s13, 0 }
   0x8   : > { %p90_p3 = scmp.eq.s32.totalorder %s320_s14, 1  ;;  %p321_p5 = scmp.ge.s32.totalorder %s520_s12, 1 }
   0x9   : > { %p573_p4 = por %p756_p1, %p60_p0  ;;  %p97_p7 = scmp.lt.s32.totalorder %s520_s12, 3 }
   0xa   : > { %p578_p6 = por %p90_p3, %p60_p0  ;;  %s589_s18 = sadd.s32 1, %s520_s12  }
   0xb   : > { %s759_s15 = scalar_select %p573_p4, 1, 0 }
   0xc   : > { %s760_s16 = scalar_select %p578_p6, 1, 0 }
   0xd   : > { %p583_p8 = pnand %p321_p5, %p97_p7  ;;  %s44_s19 = ssub.s32 %s520_s12, %s589_s18 }
   0xe   : > { %s47_s20 = sadd.s32 1, %s516_s11  ;;  %p602_p12 = scmp.eq.s32.totalorder %s44_s19, 0 }
   0xf   : > { %p349_p10 = pneg %p583_p8  ;;  %p54_p13 = scmp.ne.s32.totalorder %s516_s11, %s512_s10 }
  0x10   : > { %p55_p0 = scmp.eq.s32.totalorder %s520_s12, 0  ;;  %p362_p3 = scmp.lt.s32.totalorder %s520_s12, 2 }
  0x11   : > { %p598_p11 = pnand %p349_p10, %p756_p1  ;;  %s407_s25 = scalar_lea.hbm %s753_s0, 16 }
  0x12   : > { %p408_p5 = scmp.ne.s32.totalorder %s753_s0, %s407_s25  ;;  %p414_p1 = scmp.lt.u32.totalorder %s407_s25, %s753_s0 }
  0x13   : > { %p409_p7 = pneg %p598_p11 }
  0x15   : > { %p410_p10 = pnand %p409_p7, %p408_p5 }
  0x17   : > { %p411_p9 = pneg %p410_p10 }
  0x19   : > { %p416_p2 = pnand %p414_p1, %p411_p9 }
  0x1b   : > { %419 = shalt.err (!%p416_p2)
}
  0x1c   : > { %s522_s30 = smov [#allocation3]   ;;  %p56_p1 = por %p55_p0, %p54_p13 }
  0x1d   : > { %352 = dma.hbm_to_smem (!%p598_p11), %s753_s0, 16, %s522_s30, [#allocation6]  }
  0x1e   : > { %s629_s5 = scalar_select %p602_p12, %s516_s11, %s47_s20  }
  0x1f   : > { %p764_p2 = scmp.eq.s32.totalorder %s564_s13, 1  ;;  %s119_s7 = sand.u32 1, %s516_s11  }
  0x20   : > { %s339_s8 = sshll.u32 %s520_s12, 7  ;;  %s324_s14 = sshll.u32 %s119_s7, 3 }
  0x21   : > { %p641_p9 = por %p764_p2, %p54_p13  ;;  %s650_s23 = scalar_lea.hbm %s754_s1, %s339_s8 }
  0x22   : > { %s123_s20 = scalar_lea.vmem [#allocation7], %s324_s14  ;;  %p654_p11 = pnand %p362_p3, %p56_p1 }
  0x23   : > { %s765_s6 = scalar_select %p641_p9, 1, 0 }
  0x24   : > { %s131_s22 = sshll.u32 %s123_s20, 4  ;;  %s120_s25 = scalar_lea.sflag [#allocation4], %s119_s7  ;;  %s658_s22 = int_to_ptr.vmem [resolvable:$true] %s131_s22 }
  0x25   : > { %s420_s26 = scalar_lea.hbm %s650_s23, 128  ;;  %p422_p13 = pneg %p654_p11 }
  0x26   : > { %p421_p12 = scmp.ne.s32.totalorder %s650_s23, %s420_s26  ;;  %s425_s29 = scalar_lea.hbm %s754_s1, 256 }
  0x27   : > { %p426_p3 = scmp.lt.u32.totalorder %s650_s23, %s754_s1  ;;  %p427_p7 = scmp.lt.u32.totalorder %s425_s29, %s420_s26 }
  0x28   : > { %p423_p0 = pnand %p422_p13, %p421_p12  ;;  %p429_p1 = scmp.lt.u32.totalorder %s420_s26, %s650_s23 }
  0x29   : > { %p428_p10 = por %p427_p7, %p426_p3 }
  0x2a   : > { %p424_p5 = pneg %p423_p0 }
  0x2b   : > { %p430_p2 = por %p429_p1, %p428_p10 }
  0x2d   : > { %p431_p6 = pnand %p430_p2, %p424_p5 }
  0x2f   : > { %434 = shalt.err (!%p431_p6)
}
  0x30   : > { %s435_s4 = scalar_lea.vmem %s658_s22, 128  ;;  %s523_s7 = smov [#allocation7]  }
  0x31   : > { %p436_p12 = scmp.ne.s32.totalorder %s658_s22, %s435_s4  ;;  %s440_s8 = sshll.u32 %s523_s7, 4  ;;  %s441_s8 = int_to_ptr.vmem [resolvable:$false] %s440_s8 }
  0x32   : > { %s442_s14 = scalar_lea.vmem %s441_s8, 256  ;;  %p443_p4 = scmp.lt.s32.totalorder %s658_s22, %s441_s8 }
  0x33   : > { %p438_p0 = pnand %p436_p12, %p422_p13  ;;  %p444_p3 = scmp.lt.s32.totalorder %s442_s14, %s435_s4 }
  0x35   : > { %p439_p9 = pneg %p438_p0  ;;  %p445_p7 = por %p444_p3, %p443_p4 }
  0x37   : > { %p446_p10 = pnand %p445_p7, %p439_p9 }
  0x39   : > { %449 = shalt.err (!%p446_p10)
}
  0x3a   : > { %356 = dma.hbm_to_vmem [thread:$0]  (!%p654_p11), %s650_s23, 128, %s658_s22, %s120_s25  }
  0x3b   : > { %140 = sbr.rel (%p583_p8) target bundleno = 409 (0x199), region = 28  ;;  %p767_p6 = scmp.eq.s32.totalorder (!%p583_p8), %s564_s13, 0 }
  0x42   : > { %495 = dma.done.wait (%p767_p6), [#allocation6], 16   ;;  %p768_p13 = pmov %p767_p6 }
  0x43   : > { %s692_s19 = sand.u32 1, %s512_s10   ;;  %p769_p4 = scmp.ne.s32.totalorder %s759_s15, 0 }
  0x44   : > { %497 = vsyncadd (%p768_p13), [#allocation6], 4294967280  ;;  %s329_s21 = sshll.u32 %s692_s19, 3  ;;  %s147_s20 = scalar_lea.sflag [#allocation4], %s692_s19 }
  0x45   : > { %s150_s23 = scalar_lea.vmem [#allocation7], %s329_s21 }
  0x46   : > { %499 = dma.done.wait (%p769_p4), %s147_s20, 128  }
  0x47   : > { %501 = vsyncadd (%p769_p4), %s147_s20, 4294967168 }
  0x48   : > { %155 = sfence }
  0x49   : > { %v172_v0 = vld [vmem:[%s150_s23] sm:$0xff]  ;;  %vm176_vm0 = vcmask 1043456   ;;  %vm183_vm1 = vcmask 7168   ;;  %vm186_vm2 = vcmask 3072   ;;  %v524_v3 = vmov 0.0   ;;  %s191_s17 = sld [smem:[#allocation3]] }
  0x4a   : > { %v174_v1 = vcombine.high %v172_v0, %v172_v0  ;;  %v177_v2 = vsel %vm176_vm0, %v172_v0, 0.0  ;;  %184 = vst.msk [vmem:[#allocation2] sm:$0xff] %vm183_vm1, %v524_v3  ;;  %185 = vst.msk [vmem:[#allocation2 + $0x8] sm:$0xff] %vm183_vm1, %v524_v3  ;;  %v525_v6 = vmov 0   ;;  %s331_s22 = sld [smem:[#allocation3 + $0x1]]  ;;  %s332_s15 = sld [smem:[#allocation3 + $0x2]]  ;;  %v216_v25 = vlaneseq }
  0x4b   : > { %401 = vset.pattern.permute.xlu0 %v525_v6  ;;  %v526_v23 = vmov 839922192   ;;  %s340_s24 = sshll.u32 %s564_s13, 7  ;;  %s171_s25 = scalar_lea.vmem [#allocation8], %s329_s21 }
  0x4c   : > { %v178_v4 = vsel %vm176_vm0, %v174_v1, 0.0  ;;  %v214_v24 = vunpack.c.l.s4 %v526_v23  ;;  %v217_v27 = vshrl.u32 %v216_v25, 7  ;;  %s238_s26 = sshll.u32 %s171_s25, 4  ;;  %s709_s29 = scalar_lea.hbm %s755_s2, %s340_s24  ;;  %s711_s26 = int_to_ptr.vmem [resolvable:$true] %s238_s26 }
  0x4d   : > { %v179_v5 = vadd.f32 %v178_v4, %v177_v2  ;;  %s224_s30 = scalar_lea.sflag [#allocation5], %s692_s19  ;;  %s450_s3 = scalar_lea.vmem %s711_s26, 128 }
  0x4e   : > { %v215_v26 = vunpack.c.0.s8 %v214_v24  ;;  %p451_p8 = scmp.ne.s32.totalorder %s711_s26, %s450_s3  ;;  %p770_p9 = scmp.ne.s32.totalorder %s765_s6, 0 }
  0x4f   : > { %180 = vadd.xlane.f32.xlu0 %v179_v5  ;;  %v192_v9 = vstv %s191_s17  ;;  %s527_s13 = smov [#allocation8]  }
  0x50   : > { %v195_v10 = vstv %s331_s22  ;;  %v199_v11 = vstv %s332_s15  ;;  %v218_v28 = vsub.s32 %v215_v26, %v217_v27  ;;  %p452_p11 = pnand %p451_p8, %p770_p9  ;;  %s454_s4 = sshll.u32 %s527_s13, 4  ;;  %s455_s4 = int_to_ptr.vmem [resolvable:$false] %s454_s4 }
  0x51   : > { %s456_s7 = scalar_lea.vmem %s455_s4, 256  ;;  %p457_p1 = scmp.lt.s32.totalorder %s711_s26, %s455_s4 }
  0x52   : > { %p453_p5 = pneg %p452_p11  ;;  %p458_p2 = scmp.lt.s32.totalorder %s456_s7, %s450_s3 }
  0x54   : > { %p459_p12 = por %p458_p2, %p457_p1 }
  0x56   : > { %p460_p0 = pnand %p459_p12, %p453_p5 }
  0xdc   : > { %v181_v7 = vpop.xlane.xlu0 %180 }
  0xdd   : > { %v182_v8 = vmul.f32 0.00390625, %v181_v7 }
  0xdf   : > { %188 = vst.msk [vmem:[#allocation2 + $0x8] sm:$0xf] %vm186_vm2, %v182_v8  ;;  %v196_v15 = vmul.f32 %v195_v10, %v182_v8 }
  0xe6   : > { %v189_v12 = vld [vmem:[#allocation2 + $0x7] sm:$0xf] }
  0xe7   : > { %v190_v13 = vld [vmem:[#allocation2 + $0x9] sm:$0xf]  ;;  %v193_v14 = vmul.f32 %v192_v9, %v189_v12 }
  0xe8   : > { %v200_v17 = vmul.f32 %v199_v11, %v190_v13 }
  0xe9   : > { %v197_v16 = vadd.f32 %v196_v15, %v193_v14 }
  0xeb   : > { %v201_v18 = vadd.f32 %v200_v17, %v197_v16 }
  0xed   : > { %v333_v19 = vmul.f32 -1.442695, %v201_v18 }
  0xef   : > { %403 = vpow2.f32 %v333_v19 }
  0xf9   : > { %v404_v20 = vpop.eup %403 }
  0xfa   : > { %v205_v21 = vadd.f32 1.0, %v404_v20 }
  0xfc   : > { %405 = vrcp.f32 %v205_v21 }
 0x106   : > { %v406_v22 = vpop.eup %405 }
 0x107   : > { %211 = vperm.xlu0 %401, %v406_v22  }
 0x186   : > { %v212_v29 = vpop.permute.xlu0 %211 }
 0x187   : > { %v219_v30 = vrot.slane %v212_v29, %v218_v28 }
 0x189   : > { %v221_v31 = vmul.f32 %v219_v30, %v172_v0 }
 0x18b   : > { %222 = vst [vmem:[%s171_s25] sm:$0xff] %v221_v31 }
 0x18c   : > { %463 = shalt.err (!%p460_p0)
}
 0x18d   : > { %s464_s8 = scalar_lea.hbm %s709_s29, 128  ;;  %s468_s21 = scalar_lea.hbm %s755_s2, 256 }
 0x18e   : > { %p465_p3 = scmp.ne.s32.totalorder %s709_s29, %s464_s8  ;;  %p469_p6 = scmp.lt.u32.totalorder %s709_s29, %s755_s2 }
 0x18f   : > { %p470_p13 = scmp.lt.u32.totalorder %s468_s21, %s464_s8  ;;  %p472_p8 = scmp.lt.u32.totalorder %s464_s8, %s709_s29 }
 0x190   : > { %p466_p7 = pnand %p465_p3, %p770_p9 }
 0x191   : > { %p471_p4 = por %p470_p13, %p469_p6 }
 0x192   : > { %p467_p10 = pneg %p466_p7 }
 0x193   : > { %p473_p11 = por %p472_p8, %p471_p4 }
 0x195   : > { %p474_p5 = pnand %p473_p11, %p467_p10 }
 0x197   : > { %477 = shalt.err (!%p474_p5)
}
 0x198   : > { %347 = dma.vmem_to_hbm [thread:$0]  (%p770_p9), %s711_s26, 128, %s709_s29, %s224_s30  }
 0x199 PF: > { %s250_s17 = sand.u32 1, %s508_s9   ;;  %p771_p1 = scmp.ne.s32.totalorder %s760_s16, 0 }
 0x19a   : > { %p772_p2 = scmp.ge.s32.totalorder %s520_s12, 2  ;;  %s251_s22 = scalar_lea.sflag [#allocation5], %s250_s17 }
 0x19c   : > { %p358_p12 = pnand %p772_p2, %p771_p1 }
 0x19e   : > { %503 = dma.done.wait (!%p358_p12), %s251_s22, 128  }
 0x19f   : > { %505 = vsyncadd (!%p358_p12), %s251_s22, 4294967168  ;;  %p16_p0 = scmp.ge.s32.totalorder %s589_s18, 4   ;;  %s773_s9 = smov %s512_s10 }
 0x1a0   : > { %s774_s10 = smov %s516_s11  ;;  %s775_s11 = smov %s629_s5 }
 0x1a1   : > { %s776_s12 = smov %s589_s18  ;;  %18 = sbr.rel (!%p16_p0) target bundleno = 6 (0x6), region = 78 }
 0x1a8   :  { %256 = vsyncpa [#allocation4], 1 }
 0x1a9   :  { %258 = vsyncpa [#allocation4 + $0x1], 1 }
 0x1aa   :  { %259 = vsyncpa [#allocation5], 1 }
 0x1ab   :  { %261 = vsyncpa [#allocation5 + $0x1], 1 }
 0x1ac   :  { %262 = vsyncpa [#allocation6], 1 }
 0x1ad   :  { %264 = vsyncpa [#allocation6 + $0x1], 1 }

</bundles_post_ra>
